<compile_context>
chip_gen: v7x
topology: tpu7x:2x2x1
jax: 0.10.0
libtpu: 0.0.40
codegen_flags: <defaults>
</compile_context>

<pallas_src>
import functools

import jax
import jax.numpy as jnp
from jax import lax
from jax.experimental import pallas as pl
from jax.experimental.pallas import tpu as pltpu


IGNORE_VALUE = -1.0
LANES = 128
SUBLANES = 8
ROW_ALIGN = 32            # rows padded to a multiple of 32 (covers f32/bf16/int8 packing)
MAX_BLOCK_ROWS = 1024     # (1024,128) f32 block = 512 KiB; 2 inputs x 2 bufs = 2 MiB VMEM


def _cdiv(a, b):
    return -(-a // b)


def _round_up(a, b):
    return _cdiv(a, b) * b


def _masked_bce_kernel(n_ref, x_ref, t_ref, sum_ref, cnt_ref, *,
                       ignore_value, block_rows, steps_per_slice):
    i = pl.program_id(0)   # parallel slice (megacore / v7x dual-TC axis)
    j = pl.program_id(1)   # sequential reduction step within the slice

    @pl.when(j == 0)
    def _():
        sum_ref[...] = jnp.zeros_like(sum_ref)
        cnt_ref[...] = jnp.zeros_like(cnt_ref)

    # Global element index of every position in this (block_rows, 128) tile.
    block_id = i * steps_per_slice + j                       # logical (unclamped) block id
    base = block_id * (block_rows * LANES)
    row = lax.broadcasted_iota(jnp.int32, (block_rows, LANES), 0)
    lane = lax.broadcasted_iota(jnp.int32, (block_rows, LANES), 1)
    idx = base + row * LANES + lane
    in_range = idx < n_ref[0]

    x = x_ref[...].astype(jnp.float32)
    t = t_ref[...].astype(jnp.float32)
    # Sanitize out-of-range data (pad region, partial edge tile, or the clamped
    # duplicate tile) so the log terms stay finite; those positions are masked.
    x = jnp.where(in_range, x, jnp.float32(0.5))
    t = jnp.where(in_range, t, jnp.float32(ignore_value))

    mask = in_range & (t != jnp.float32(ignore_value))

    # BCE with torch-style clamp of the log terms at -100.
    log_x = jnp.maximum(jnp.log(x), jnp.float32(-100.0))
    log_1mx = jnp.maximum(jnp.log(1.0 - x), jnp.float32(-100.0))
    bce = -(t * log_x + (1.0 - t) * log_1mx)

    contrib = jnp.where(mask, bce, jnp.float32(0.0))
    counts = mask.astype(jnp.float32)

    # Reduce the (block_rows, 128) tile to a vreg-shaped (8, 128) partial.
    # The reshape splits only the sublane-major axis (tile-aligned -> free) and
    # the axis-0 sum is plain vreg adds on the VPU (no XLU cross-lane work).
    psum = contrib.reshape(block_rows // SUBLANES, SUBLANES, LANES).sum(axis=0)
    pcnt = counts.reshape(block_rows // SUBLANES, SUBLANES, LANES).sum(axis=0)

    sum_ref[...] += psum
    cnt_ref[...] += pcnt


def masked_loss(inputs, targets, ignore_value=IGNORE_VALUE, *,
                max_block_rows=MAX_BLOCK_ROWS):
    """Pallas implementation of MaskedLoss.forward (returns a f32 scalar)."""
    x = jnp.asarray(inputs).reshape(-1)   # keep native dtype; cast in-kernel
    t = jnp.asarray(targets).reshape(-1)
    n = x.shape[0]
    if n == 0:
        return jnp.float32(0.0)

    # Pad only to a 32*128-element boundary (a few KiB at most); the real tail
    # handling is done in-kernel with the element count `n`.
    n_pad = _round_up(n, ROW_ALIGN * LANES)
    if n_pad != n:
        x = jnp.pad(x, (0, n_pad - n))
        t = jnp.pad(t, (0, n_pad - n))

    rows = n_pad // LANES                       # multiple of 32
    x2 = x.reshape(rows, LANES)
    t2 = t.reshape(rows, LANES)

    max_block_rows = max(ROW_ALIGN, (max_block_rows // ROW_ALIGN) * ROW_ALIGN)
    block_rows = min(max_block_rows, rows)
    total_blocks = _cdiv(rows, block_rows)
    num_slices = 2 if total_blocks >= 2 else 1  # 2 -> both v7x TensorCores
    steps_per_slice = _cdiv(total_blocks, num_slices)
    last_block = total_blocks - 1

    def in_index_map(i, j, n_sm):
        # Clamp so the DMA never targets a fully out-of-range tile; the
        # in-kernel index mask zeroes any duplicated / padded contribution.
        return (jnp.minimum(i * steps_per_slice + j, last_block), 0)

    def out_index_map(i, j, n_sm):
        return (i, 0, 0)

    kernel = functools.partial(
        _masked_bce_kernel,
        ignore_value=float(ignore_value),
        block_rows=block_rows,
        steps_per_slice=steps_per_slice)

    sum_out, cnt_out = pl.pallas_call(
        kernel,
        out_shape=(
            jax.ShapeDtypeStruct((num_slices, SUBLANES, LANES), jnp.float32),
            jax.ShapeDtypeStruct((num_slices, SUBLANES, LANES), jnp.float32),
        ),
        grid_spec=pltpu.PrefetchScalarGridSpec(
            num_scalar_prefetch=1,
            grid=(num_slices, steps_per_slice),
            in_specs=[
                pl.BlockSpec((block_rows, LANES), in_index_map),
                pl.BlockSpec((block_rows, LANES), in_index_map),
            ],
            out_specs=[
                pl.BlockSpec((None, SUBLANES, LANES), out_index_map),
                pl.BlockSpec((None, SUBLANES, LANES), out_index_map),
            ],
        ),
        compiler_params=pltpu.CompilerParams(
            dimension_semantics=("parallel", "arbitrary")),
    )(jnp.array([n], jnp.int32), x2, t2)

    s = jnp.sum(sum_out)
    c = jnp.sum(cnt_out)
    return jnp.where(c > 0, s / jnp.maximum(c, 1.0), jnp.float32(0.0))


def _reference_masked_loss(inputs, targets, ignore_value=IGNORE_VALUE):
    x = jnp.asarray(inputs, jnp.float32).reshape(-1)
    t = jnp.asarray(targets, jnp.float32).reshape(-1)
    mask = t != ignore_value
    log_x = jnp.maximum(jnp.log(x), -100.0)
    log_1mx = jnp.maximum(jnp.log(1.0 - x), -100.0)
    bce = -(t * log_x + (1.0 - t) * log_1mx)
    bce = jnp.where(mask, bce, 0.0)
    cnt = jnp.sum(mask.astype(jnp.float32))
    return jnp.where(cnt > 0, jnp.sum(bce) / jnp.maximum(cnt, 1.0), 0.0)


if __name__ == "__main__":
    key = jax.random.PRNGKey(0)
    k1, k2, k3, k4, k5, k6 = jax.random.split(key, 6)

    # Main small case: batch=8, num_labels=32 multi-label setup, f32.
    batch, num_labels = 8, 32
    inputs = jax.nn.sigmoid(jax.random.normal(k1, (batch, num_labels)))
    targets = (jax.random.uniform(k2, (batch, num_labels)) > 0.5).astype(jnp.float32)
    ignore_mask = jax.random.uniform(k3, (batch, num_labels)) < 0.3
    targets = jnp.where(ignore_mask, IGNORE_VALUE, targets)

    loss = masked_loss(inputs, targets)
    jax.block_until_ready(loss)
    ref = _reference_masked_loss(inputs, targets)
    assert jnp.allclose(loss, ref, rtol=1e-5, atol=1e-5), (loss, ref)

    # All-ignored path must return 0.0.
    all_ignored = jnp.full((batch, num_labels), IGNORE_VALUE, jnp.float32)
    loss_empty = masked_loss(inputs, all_ignored)
    jax.block_until_ready(loss_empty)
    assert jnp.allclose(loss_empty, 0.0), loss_empty

    # Ragged size + multi-block grid: exercises the tail pad, partial edge
    # tile, both parallel slices, and the clamped duplicate tile.
    b2, l2 = 40, 300
    x_r = jax.nn.sigmoid(jax.random.normal(k4, (b2, l2)))
    t_r = (jax.random.uniform(k5, (b2, l2)) > 0.5).astype(jnp.float32)
    t_r = jnp.where(jax.random.uniform(k6, (b2, l2)) < 0.25, IGNORE_VALUE, t_r)
    loss_r = masked_loss(x_r, t_r, max_block_rows=32)
    jax.block_until_ready(loss_r)
    ref_r = _reference_masked_loss(x_r, t_r)
    assert jnp.allclose(loss_r, ref_r, rtol=1e-5, atol=1e-5), (loss_r, ref_r)

    # bf16 inputs stream through in native dtype (cast to f32 inside kernel).
    loss_b = masked_loss(inputs.astype(jnp.bfloat16), targets.astype(jnp.bfloat16))
    jax.block_until_ready(loss_b)
    ref_b = _reference_masked_loss(inputs.astype(jnp.bfloat16),
                                   targets.astype(jnp.bfloat16))
    assert jnp.allclose(loss_b, ref_b, rtol=1e-5, atol=1e-5), (loss_b, ref_b)

    print("KERNEL_OK")
</pallas_src>

<mosaic_0001>
module attributes {stable_mosaic.version = 11 : i64} {
  func.func @_masked_bce_kernel(%arg0: i32, %arg1: i32, %arg2: memref<1xi32, #tpu.memory_space<smem>>, %arg3: memref<32x128xf32, #tpu.memory_space<vmem>>, %arg4: memref<32x128xf32, #tpu.memory_space<vmem>>, %arg5: memref<1x8x128xf32, #tpu.memory_space<vmem>>, %arg6: memref<1x8x128xf32, #tpu.memory_space<vmem>>) attributes {dimension_semantics = [#tpu.dimension_semantics<parallel>, #tpu.dimension_semantics<arbitrary>], iteration_bounds = array<i64: 1, 1>, scalar_prefetch = 1 : i64, scratch_operands = 0 : i64, tpu.core_type = #tpu.core_type<tc>, window_params = [{transform_indices = @transform_0, window_bounds = array<i64: 32, 128>}, {transform_indices = @transform_1, window_bounds = array<i64: 32, 128>}, {transform_indices = @transform_2, window_bounds = array<i64: 1, 8, 128>}, {transform_indices = @transform_3, window_bounds = array<i64: 1, 8, 128>}]} {
    %c0_i32 = arith.constant 0 : i32
    %0 = arith.cmpi eq, %arg1, %c0_i32 : i32
    %1 = arith.extui %0 : i1 to i32
    %c0_i32_0 = arith.constant 0 : i32
    %2 = arith.cmpi ne, %1, %c0_i32_0 : i32
    scf.if %2 {
      %cst_27 = arith.constant 0.000000e+00 : f32
      %60 = vector.broadcast %cst_27 : f32 to vector<8x128xf32>
      %c0_28 = arith.constant 0 : index
      %c0_29 = arith.constant 0 : index
      %c0_30 = arith.constant 0 : index
      %61 = vector.load %arg5[%c0_28, %c0_29, %c0_30] : memref<1x8x128xf32, #tpu.memory_space<vmem>>, vector<1x8x128xf32>
      %62 = vector.shape_cast %61 : vector<1x8x128xf32> to vector<8x128xf32>
      %63 = vector.shape_cast %60 : vector<8x128xf32> to vector<1x8x128xf32>
      tpu.vector_store %arg5[%c0_28, %c0_29, %c0_30], %63 {strides = array<i32>} : memref<1x8x128xf32, #tpu.memory_space<vmem>>, vector<1x8x128xf32>,
      %cst_31 = arith.constant 0.000000e+00 : f32
      %64 = vector.broadcast %cst_31 : f32 to vector<8x128xf32>
      %c0_32 = arith.constant 0 : index
      %c0_33 = arith.constant 0 : index
      %c0_34 = arith.constant 0 : index
      %65 = vector.load %arg6[%c0_32, %c0_33, %c0_34] : memref<1x8x128xf32, #tpu.memory_space<vmem>>, vector<1x8x128xf32>
      %66 = vector.shape_cast %65 : vector<1x8x128xf32> to vector<8x128xf32>
      %67 = vector.shape_cast %64 : vector<8x128xf32> to vector<1x8x128xf32>
      tpu.vector_store %arg6[%c0_32, %c0_33, %c0_34], %67 {strides = array<i32>} : memref<1x8x128xf32, #tpu.memory_space<vmem>>, vector<1x8x128xf32>,
    } else {
    }
    %c1_i32 = arith.constant 1 : i32
    %3 = arith.muli %arg0, %c1_i32 : i32
    %4 = arith.addi %3, %arg1 : i32
    %c4096_i32 = arith.constant 4096 : i32
    %5 = arith.muli %4, %c4096_i32 : i32
    %6 = tpu.iota {dimensions = array<i32: 0>} : vector<32x128xi32>
    %7 = tpu.iota {dimensions = array<i32: 1>} : vector<32x128xi32>
    %c128_i32 = arith.constant 128 : i32
    %8 = vector.broadcast %c128_i32 : i32 to vector<32x128xi32>
    %9 = arith.muli %6, %8 : vector<32x128xi32>
    %10 = vector.broadcast %5 : i32 to vector<32x128xi32>
    %11 = arith.addi %10, %9 : vector<32x128xi32>
    %12 = arith.addi %11, %7 : vector<32x128xi32>
    %c0 = arith.constant 0 : index
    %13 = memref.load %arg2[%c0] : memref<1xi32, #tpu.memory_space<smem>>
    %14 = vector.broadcast %13 : i32 to vector<32x128xi32>
    %15 = arith.cmpi slt, %12, %14 : vector<32x128xi32>
    %c0_1 = arith.constant 0 : index
    %c0_2 = arith.constant 0 : index
    %16 = vector.load %arg3[%c0_1, %c0_2] : memref<32x128xf32, #tpu.memory_space<vmem>>, vector<32x128xf32>
    %c0_3 = arith.constant 0 : index
    %c0_4 = arith.constant 0 : index
    %17 = vector.load %arg4[%c0_3, %c0_4] : memref<32x128xf32, #tpu.memory_space<vmem>>, vector<32x128xf32>
    %cst = arith.constant 5.000000e-01 : f32
    %18 = vector.broadcast %cst : f32 to vector<32x128xf32>
    %19 = arith.select %15, %16, %18 : vector<32x128xi1>, vector<32x128xf32>
    %cst_5 = arith.constant -1.000000e+00 : f32
    %20 = vector.broadcast %cst_5 : f32 to vector<32x128xf32>
    %21 = arith.select %15, %17, %20 : vector<32x128xi1>, vector<32x128xf32>
    %cst_6 = arith.constant -1.000000e+00 : f32
    %22 = vector.broadcast %cst_6 : f32 to vector<32x128xf32>
    %23 = arith.cmpf one, %21, %22 : vector<32x128xf32>
    %24 = arith.andi %15, %23 : vector<32x128xi1>
    %25 = math.log %19 : vector<32x128xf32>
    %cst_7 = arith.constant -1.000000e+02 : f32
    %26 = vector.broadcast %cst_7 : f32 to vector<32x128xf32>
    %27 = arith.maximumf %25, %26 : vector<32x128xf32>
    %cst_8 = arith.constant 1.000000e+00 : f32
    %28 = vector.broadcast %cst_8 : f32 to vector<32x128xf32>
    %29 = arith.subf %28, %19 : vector<32x128xf32>
    %30 = math.log %29 : vector<32x128xf32>
    %cst_9 = arith.constant -1.000000e+02 : f32
    %31 = vector.broadcast %cst_9 : f32 to vector<32x128xf32>
    %32 = arith.maximumf %30, %31 : vector<32x128xf32>
    %33 = arith.mulf %21, %27 : vector<32x128xf32>
    %cst_10 = arith.constant 1.000000e+00 : f32
    %34 = vector.broadcast %cst_10 : f32 to vector<32x128xf32>
    %35 = arith.subf %34, %21 : vector<32x128xf32>
    %36 = arith.mulf %35, %32 : vector<32x128xf32>
    %37 = arith.addf %33, %36 : vector<32x128xf32>
    %cst_11 = arith.constant 0.000000e+00 : f32
    %38 = vector.broadcast %cst_11 : f32 to vector<32x128xf32>
    %39 = arith.subf %38, %37 : vector<32x128xf32>
    %cst_12 = arith.constant 0.000000e+00 : f32
    %40 = vector.broadcast %cst_12 : f32 to vector<32x128xf32>
    %41 = arith.select %24, %39, %40 : vector<32x128xi1>, vector<32x128xf32>
    %42 = arith.extui %24 : vector<32x128xi1> to vector<32x128xi32>
    %43 = arith.sitofp %42 : vector<32x128xi32> to vector<32x128xf32>
    %44 = vector.shape_cast %41 : vector<32x128xf32> to vector<4x8x128xf32>
    %cst_13 = arith.constant dense<0.000000e+00> : vector<8x128xf32>
    %45 = vector.multi_reduction <add>, %44, %cst_13 [0] : vector<4x8x128xf32> to vector<8x128xf32>
    %46 = vector.shape_cast %43 : vector<32x128xf32> to vector<4x8x128xf32>
    %cst_14 = arith.constant dense<0.000000e+00> : vector<8x128xf32>
    %47 = vector.multi_reduction <add>, %46, %cst_14 [0] : vector<4x8x128xf32> to vector<8x128xf32>
    %c0_15 = arith.constant 0 : index
    %c0_16 = arith.constant 0 : index
    %c0_17 = arith.constant 0 : index
    %48 = vector.load %arg5[%c0_15, %c0_16, %c0_17] : memref<1x8x128xf32, #tpu.memory_space<vmem>>, vector<1x8x128xf32>
    %49 = vector.shape_cast %48 : vector<1x8x128xf32> to vector<8x128xf32>
    %50 = arith.addf %49, %45 : vector<8x128xf32>
    %c0_18 = arith.constant 0 : index
    %c0_19 = arith.constant 0 : index
    %c0_20 = arith.constant 0 : index
    %51 = vector.load %arg5[%c0_18, %c0_19, %c0_20] : memref<1x8x128xf32, #tpu.memory_space<vmem>>, vector<1x8x128xf32>
    %52 = vector.shape_cast %51 : vector<1x8x128xf32> to vector<8x128xf32>
    %53 = vector.shape_cast %50 : vector<8x128xf32> to vector<1x8x128xf32>
    tpu.vector_store %arg5[%c0_18, %c0_19, %c0_20], %53 {strides = array<i32>} : memref<1x8x128xf32, #tpu.memory_space<vmem>>, vector<1x8x128xf32>,
    %c0_21 = arith.constant 0 : index
    %c0_22 = arith.constant 0 : index
    %c0_23 = arith.constant 0 : index
    %54 = vector.load %arg6[%c0_21, %c0_22, %c0_23] : memref<1x8x128xf32, #tpu.memory_space<vmem>>, vector<1x8x128xf32>
    %55 = vector.shape_cast %54 : vector<1x8x128xf32> to vector<8x128xf32>
    %56 = arith.addf %55, %47 : vector<8x128xf32>
    %c0_24 = arith.constant 0 : index
    %c0_25 = arith.constant 0 : index
    %c0_26 = arith.constant 0 : index
    %57 = vector.load %arg6[%c0_24, %c0_25, %c0_26] : memref<1x8x128xf32, #tpu.memory_space<vmem>>, vector<1x8x128xf32>
    %58 = vector.shape_cast %57 : vector<1x8x128xf32> to vector<8x128xf32>
    %59 = vector.shape_cast %56 : vector<8x128xf32> to vector<1x8x128xf32>
    tpu.vector_store %arg6[%c0_24, %c0_25, %c0_26], %59 {strides = array<i32>} : memref<1x8x128xf32, #tpu.memory_space<vmem>>, vector<1x8x128xf32>,
    return
  }
  func.func @transform_0(%arg0: i32, %arg1: i32, %arg2: memref<1xi32, #tpu.memory_space<smem>>) -> (i32, i32) {
    %c1_i32 = arith.constant 1 : i32
    %0 = arith.muli %arg0, %c1_i32 : i32
    %1 = arith.addi %0, %arg1 : i32
    %c0_i32 = arith.constant 0 : i32
    %2 = arith.minsi %1, %c0_i32 : i32
    %c0_i32_0 = arith.constant 0 : i32
    %c0_i32_1 = arith.constant 0 : i32
    return %2, %c0_i32_0 : i32, i32
  }
  func.func @transform_1(%arg0: i32, %arg1: i32, %arg2: memref<1xi32, #tpu.memory_space<smem>>) -> (i32, i32) {
    %c1_i32 = arith.constant 1 : i32
    %0 = arith.muli %arg0, %c1_i32 : i32
    %1 = arith.addi %0, %arg1 : i32
    %c0_i32 = arith.constant 0 : i32
    %2 = arith.minsi %1, %c0_i32 : i32
    %c0_i32_0 = arith.constant 0 : i32
    %c0_i32_1 = arith.constant 0 : i32
    return %2, %c0_i32_0 : i32, i32
  }
  func.func @transform_2(%arg0: i32, %arg1: i32, %arg2: memref<1xi32, #tpu.memory_space<smem>>) -> (i32, i32, i32) {
    %c0_i32 = arith.constant 0 : i32
    %c0_i32_0 = arith.constant 0 : i32
    %c0_i32_1 = arith.constant 0 : i32
    return %arg0, %c0_i32, %c0_i32_0 : i32, i32, i32
  }
  func.func @transform_3(%arg0: i32, %arg1: i32, %arg2: memref<1xi32, #tpu.memory_space<smem>>) -> (i32, i32, i32) {
    %c0_i32 = arith.constant 0 : i32
    %c0_i32_0 = arith.constant 0 : i32
    %c0_i32_1 = arith.constant 0 : i32
    return %arg0, %c0_i32, %c0_i32_0 : i32, i32, i32
  }
}

</mosaic_0001>

<bundles_post_ra>
// kernel: tpu_custom_call.1
= control target key start
LH: loop header
LB: loop body
LE: loop exit
PB: predicated region body
PF: predicated region fallthrough
CT: control target
= control target key end

     0   :  { %11 = vsyncpa [#allocation5], 0  ;;  %s499_s0 = inlined_call_operand.<no memory space> [shape: s32[1], index: 0, kind: input, shape index: {}]   ;;  %s500_s1 = inlined_call_operand.hbm [shape: f32[32,128], index: 1, kind: input, shape index: {}]   ;;  %s501_s2 = inlined_call_operand.hbm [shape: f32[32,128], index: 2, kind: input, shape index: {}]   ;;  %s502_s3 = inlined_call_operand.hbm [shape: f32[1,8,128], index: 3, kind: output, shape index: {0}]   ;;  %s503_s4 = inlined_call_operand.hbm [shape: f32[1,8,128], index: 4, kind: output, shape index: {1}]  }
   0x1   :  { %12 = vsyncpa [#allocation8], 0 }
   0x2   :  { %13 = vsyncpa [#allocation6], 0 }
   0x3   :  { %14 = vsyncpa [#allocation11], 0  ;;  %s352_s15 = smov [#allocation4]   ;;  %s256_s19 = scalar_lea.hbm %s500_s1, 512 }
   0x4   :  { %s26_s16 = sshll.u32 %s352_s15, 4  ;;  %p257_p0 = scmp.ne.s32.totalorder %s500_s1, %s256_s19  ;;  %s27_s16 = int_to_ptr.vmem [resolvable:$true] %s26_s16 }
   0x5   :  { %p260_p1 = scmp.lt.u32.totalorder %s256_s19, %s500_s1 }
   0x7   :  { %p262_p2 = pnand %p260_p1, %p257_p0 }
   0x9   :  { %265 = shalt.err (!%p262_p2)
}
   0xa   :  { %s266_s24 = scalar_lea.vmem %s27_s16, 512  ;;  %p271_p4 = scmp.lt.s32.totalorder %s27_s16, %s27_s16 }
   0xb   :  { %p267_p3 = scmp.ne.s32.totalorder %s27_s16, %s266_s24  ;;  %p272_p5 = scmp.lt.s32.totalorder %s266_s24, %s266_s24 }
   0xd   :  { %p273_p6 = por %p272_p5, %p271_p4 }
   0xf   :  { %p274_p7 = pnand %p273_p6, %p267_p3 }
  0x11   :  { %277 = shalt.err (!%p274_p7)
}
  0x12   :  { %s353_s25 = smov 128   ;;  %s354_s26 = smov 8  }
  0x13   :  { %32 = dma.hbm_to_vmem [thread:$0]  %s500_s1, 512, %s27_s16, [#allocation5], %s353_s25, %s353_s25, %s354_s26  }
  0x14   :  { %s355_s29 = smov [#allocation7]   ;;  %s278_s7 = scalar_lea.hbm %s501_s2, 512 }
  0x15   :  { %s44_s30 = sshll.u32 %s355_s29, 4  ;;  %p279_p8 = scmp.ne.s32.totalorder %s501_s2, %s278_s7  ;;  %s45_s30 = int_to_ptr.vmem [resolvable:$true] %s44_s30 }
  0x16   :  { %p282_p9 = scmp.lt.u32.totalorder %s278_s7, %s501_s2 }
  0x18   :  { %p284_p10 = pnand %p282_p9, %p279_p8 }
  0x1a   :  { %287 = shalt.err (!%p284_p10)
}
  0x1b   :  { %s288_s12 = scalar_lea.vmem %s45_s30, 512  ;;  %p293_p12 = scmp.lt.s32.totalorder %s45_s30, %s45_s30 }
  0x1c   :  { %p289_p11 = scmp.ne.s32.totalorder %s45_s30, %s288_s12  ;;  %p294_p13 = scmp.lt.s32.totalorder %s288_s12, %s288_s12 }
  0x1e   :  { %p295_p0 = por %p294_p13, %p293_p12 }
  0x20   :  { %p296_p1 = pnand %p295_p0, %p289_p11 }
  0x22   :  { %299 = shalt.err (!%p296_p1)
}
  0x23   :  { %50 = dma.hbm_to_vmem [thread:$0]  %s501_s2, 512, %s45_s30, [#allocation8], %s353_s25, %s353_s25, %s354_s26  }
  0x24   :  { %344 = dma.done.wait [#allocation5], 512  }
  0x25   :  { %345 = vsyncadd [#allocation5], 4294966784 }
  0x26   :  { %346 = dma.done.wait [#allocation8], 512  }
  0x27   :  { %347 = vsyncadd [#allocation8], 4294966784  ;;  %v73_v0 = vlaneseq  ;;  %v94_v7 = vstv %s499_s0  ;;  %v99_v12 = vld [vmem:[#allocation4] sm:$0xff]  ;;  %v100_v13 = vld [vmem:[#allocation4 + $0x8] sm:$0xff]  ;;  %v356_v39 = vmov 0.0   ;;  %s357_s0 = smov [#allocation10]  }
  0x28   :  { %v101_v16 = vld [vmem:[#allocation4 + $0x10] sm:$0xff]  ;;  %v103_v17 = vld [vmem:[#allocation7] sm:$0xff]  ;;  %v104_v18 = vld [vmem:[#allocation7 + $0x8] sm:$0xff]  ;;  %s211_s2 = sshll.u32 %s357_s0, 4  ;;  %s212_s2 = int_to_ptr.vmem [resolvable:$true] %s211_s2 }
  0x29   :  { %v74_v1 = vshrl.u32 %v73_v0, 7  ;;  %v79_v2 = vand.u32 127, %v73_v0  ;;  %v102_v20 = vld [vmem:[#allocation4 + $0x18] sm:$0xff]  ;;  %v105_v21 = vld [vmem:[#allocation7 + $0x10] sm:$0xff]  ;;  %s300_s16 = scalar_lea.vmem %s212_s2, 128  ;;  %p305_p3 = scmp.lt.s32.totalorder %s212_s2, %s212_s2 }
  0x2a   :  { %v106_v22 = vld [vmem:[#allocation7 + $0x18] sm:$0xff]  ;;  %p301_p2 = scmp.ne.s32.totalorder %s212_s2, %s300_s16  ;;  %p306_p4 = scmp.lt.s32.totalorder %s300_s16, %s300_s16 }
  0x2b   :  { %v75_v3 = vadd.s32 8, %v74_v1  ;;  %v76_v4 = vadd.s32 16, %v74_v1  ;;  %v77_v5 = vadd.s32 24, %v74_v1  ;;  %v80_v6 = vmul.u32 128, %v74_v1 }
  0x2c   :  { %p307_p5 = por %p306_p4, %p305_p3 }
  0x2d   :  { %v81_v8 = vmul.u32 128, %v75_v3  ;;  %v82_v9 = vmul.u32 128, %v76_v4  ;;  %v89_v10 = vadd.s32 %v80_v6, %v79_v2 }
  0x2e   :  { %v83_v11 = vmul.u32 128, %v77_v5  ;;  %p308_p6 = pnand %p307_p5, %p301_p2 }
  0x2f   :  { %v90_v14 = vadd.s32 %v81_v8, %v79_v2  ;;  %v91_v15 = vadd.s32 %v82_v9, %v79_v2  ;;  %vm95_vm0 = vcmp.lt.s32.totalorder %v89_v10, %v94_v7 }
  0x30   :  { %v92_v19 = vadd.s32 %v83_v11, %v79_v2  ;;  %v107_v23 = vsel %vm95_vm0, %v99_v12, 0.5  ;;  %v413_v24 = vsel %vm95_vm0, %v103_v17, -1.0 }
  0x31   :  { %vm96_vm1 = vcmp.lt.s32.totalorder %v90_v14, %v94_v7  ;;  %vm97_vm2 = vcmp.lt.s32.totalorder %v91_v15, %v94_v7  ;;  %vm115_vm3 = vcmp.ne.f32.partialorder %v413_v24, -1.0  ;;  %240 = vlog2.f32 %v107_v23 }
  0x32   :  { %vm98_vm4 = vcmp.lt.s32.totalorder %v92_v19, %v94_v7  ;;  %v108_v25 = vsel %vm96_vm1, %v100_v13, 0.5  ;;  %v109_v26 = vsel %vm97_vm2, %v101_v16, 0.5  ;;  %v419_v27 = vsel %vm96_vm1, %v104_v18, -1.0  ;;  %vm430_vm6 = vmand %vm95_vm0, %vm115_vm3 }
  0x33   :  { %v110_v28 = vsel %vm98_vm4, %v102_v20, 0.5  ;;  %v423_v29 = vsel %vm97_vm2, %v105_v21, -1.0  ;;  %v426_v30 = vsel %vm98_vm4, %v106_v22, -1.0  ;;  %vm116_vm5 = vcmp.ne.f32.partialorder %v419_v27, -1.0 }
  0x34   :  { %vm117_vm7 = vcmp.ne.f32.partialorder %v423_v29, -1.0  ;;  %vm118_vm8 = vcmp.ne.f32.partialorder %v426_v30, -1.0  ;;  %vm437_vm9 = vmand %vm96_vm1, %vm116_vm5  ;;  %242 = vlog2.f32 %v108_v25  ;;  %v135_v33 = vsub.f32 1.0, %v107_v23 }
  0x35   :  { %vm442_vm10 = vmand %vm97_vm2, %vm117_vm7  ;;  %244 = vlog2.f32 %v109_v26  ;;  %v136_v35 = vsub.f32 1.0, %v108_v25  ;;  %v137_v36 = vsub.f32 1.0, %v109_v26  ;;  %v138_v38 = vsub.f32 1.0, %v110_v28 }
  0x36   :  { %vm447_vm11 = vmand %vm98_vm4, %vm118_vm8  ;;  %246 = vlog2.f32 %v110_v28  ;;  %v229_v40 = vsel %vm430_vm6, 1.0, %v356_v39  ;;  %v230_v41 = vsel %vm437_vm9, 1.0, %v356_v39  ;;  %v231_v42 = vsel %vm442_vm10, 1.0, %v356_v39 }
  0x37   :  { %248 = vlog2.f32 %v135_v33  ;;  %v186_v43 = vadd.f32 %v230_v41, %v229_v40  ;;  %v232_v44 = vsel %vm447_vm11, 1.0, %v356_v39 }
  0x38   :  { %250 = vlog2.f32 %v136_v35 }
  0x39   :  { %252 = vlog2.f32 %v137_v36  ;;  %v187_v45 = vadd.f32 %v231_v42, %v186_v43 }
  0x3a   :  { %254 = vlog2.f32 %v138_v38 }
  0x3b   :  { %v241_v46 = vpop.eup %240  ;;  %v188_v48 = vadd.f32 %v232_v44, %v187_v45 }
  0x3c   :  { %v124_v47 = vmul.f32 0.6931472, %v241_v46 }
  0x3d   :  { %194 = vst [vmem:[#allocation10] sm:$0xff] %v188_v48 }
  0x3e   :  { %v243_v49 = vpop.eup %242  ;;  %v131_v54 = vmax.f32 %v124_v47, -100.0 }
  0x3f   :  { %v245_v50 = vpop.eup %244  ;;  %v126_v51 = vmul.f32 0.6931472, %v243_v49 }
  0x40   :  { %v247_v52 = vpop.eup %246  ;;  %v128_v53 = vmul.f32 0.6931472, %v245_v50 }
  0x41   :  { %v249_v55 = vpop.eup %248  ;;  %v130_v56 = vmul.f32 0.6931472, %v247_v52  ;;  %v132_v57 = vmax.f32 %v126_v51, -100.0 }
  0x42   :  { %311 = shalt.err (!%p308_p6)
}
  0x43   :  { %s312_s19 = scalar_lea.hbm %s503_s4, 128 }
  0x44   :  { %p313_p7 = scmp.ne.s32.totalorder %s503_s4, %s312_s19  ;;  %p316_p8 = scmp.lt.u32.totalorder %s312_s19, %s503_s4 }
  0x46   :  { %p318_p9 = pnand %p316_p8, %p313_p7 }
  0x48   :  { %321 = shalt.err (!%p318_p9)
}
  0x49   :  { %214 = dma.vmem_to_hbm [thread:$0]  %s212_s2, 128, %s503_s4, [#allocation11]   ;;  %v251_v58 = vpop.eup %250  ;;  %v133_v59 = vmax.f32 %v128_v53, -100.0  ;;  %v140_v60 = vmul.f32 0.6931472, %v249_v55  ;;  %v155_v61 = vsub.f32 1.0, %v413_v24  ;;  %v151_v5 = vmul.f32 %v131_v54, %v413_v24 }
  0x4a   :  { %v253_v62 = vpop.eup %252  ;;  %v134_v63 = vmax.f32 %v130_v56, -100.0  ;;  %v142_v0 = vmul.f32 0.6931472, %v251_v58  ;;  %v156_v1 = vsub.f32 1.0, %v419_v27  ;;  %v157_v6 = vsub.f32 1.0, %v423_v29  ;;  %s358_s4 = smov [#allocation9]  }
  0x4b   :  { %v255_v2 = vpop.eup %254  ;;  %v144_v3 = vmul.f32 0.6931472, %v253_v62  ;;  %v147_v4 = vmax.f32 %v140_v60, -100.0  ;;  %v152_v9 = vmul.f32 %v132_v57, %v419_v27  ;;  %v158_v10 = vsub.f32 1.0, %v426_v30  ;;  %s201_s26 = sshll.u32 %s358_s4, 4  ;;  %s202_s26 = int_to_ptr.vmem [resolvable:$true] %s201_s26 }
  0x4c   :  { %v146_v7 = vmul.f32 0.6931472, %v255_v2  ;;  %v148_v8 = vmax.f32 %v142_v0, -100.0  ;;  %v153_v12 = vmul.f32 %v133_v59, %v423_v29  ;;  %v154_v15 = vmul.f32 %v134_v63, %v426_v30  ;;  %s322_s27 = scalar_lea.vmem %s202_s26, 128  ;;  %p327_p11 = scmp.lt.s32.totalorder %s202_s26, %s202_s26 }
  0x4d   :  { %v149_v11 = vmax.f32 %v144_v3, -100.0  ;;  %v159_v13 = vmul.f32 %v155_v61, %v147_v4  ;;  %p323_p10 = scmp.ne.s32.totalorder %s202_s26, %s322_s27  ;;  %p328_p12 = scmp.lt.s32.totalorder %s322_s27, %s322_s27 }
  0x4e   :  { %v150_v14 = vmax.f32 %v146_v7, -100.0  ;;  %v160_v16 = vmul.f32 %v156_v1, %v148_v8 }
  0x4f   :  { %v161_v17 = vmul.f32 %v157_v6, %v149_v11  ;;  %v163_v18 = vadd.f32 %v159_v13, %v151_v5  ;;  %p329_p13 = por %p328_p12, %p327_p11 }
  0x50   :  { %v162_v19 = vmul.f32 %v158_v10, %v150_v14  ;;  %v164_v20 = vadd.f32 %v160_v16, %v152_v9 }
  0x51   :  { %v165_v21 = vadd.f32 %v161_v17, %v153_v12  ;;  %v167_v22 = vsub.f32 0.0, %v163_v18  ;;  %p330_p0 = pnand %p329_p13, %p323_p10 }
  0x52   :  { %v166_v23 = vadd.f32 %v162_v19, %v154_v15  ;;  %v168_v24 = vsub.f32 0.0, %v164_v20 }
  0x53   :  { %v169_v25 = vsub.f32 0.0, %v165_v21  ;;  %v171_v26 = vsel %vm430_vm6, %v167_v22, 0.0 }
  0x54   :  { %v170_v27 = vsub.f32 0.0, %v166_v23  ;;  %v172_v28 = vsel %vm437_vm9, %v168_v24, 0.0 }
  0x55   :  { %v173_v29 = vsel %vm442_vm10, %v169_v25, 0.0  ;;  %v183_v30 = vadd.f32 %v172_v28, %v171_v26 }
  0x56   :  { %v174_v33 = vsel %vm447_vm11, %v170_v27, 0.0 }
  0x57   :  { %v184_v35 = vadd.f32 %v183_v30, %v173_v29 }
  0x59   :  { %v185_v36 = vadd.f32 %v184_v35, %v174_v33 }
  0x5b   :  { %191 = vst [vmem:[#allocation9] sm:$0xff] %v185_v36 }
  0x5c   :  { %333 = shalt.err (!%p330_p0)
}
  0x5d   :  { %s334_s30 = scalar_lea.hbm %s502_s3, 128 }
  0x5e   :  { %p335_p1 = scmp.ne.s32.totalorder %s502_s3, %s334_s30  ;;  %p338_p2 = scmp.lt.u32.totalorder %s334_s30, %s502_s3 }
  0x60   :  { %p340_p3 = pnand %p338_p2, %p335_p1 }
  0x62   :  { %343 = shalt.err (!%p340_p3)
}
  0x63   :  { %204 = dma.vmem_to_hbm [thread:$0]  %s202_s26, 128, %s502_s3, [#allocation6]  }
  0x64   :  { %348 = dma.done.wait [#allocation6], 128  }
  0x65   :  { %349 = vsyncadd [#allocation6], 4294967168 }
  0x66   :  { %350 = dma.done.wait [#allocation11], 128  }
  0x67   :  { %351 = vsyncadd [#allocation11], 4294967168 }
  0x68   :  { %221 = vsyncpa [#allocation5], 1 }
  0x69   :  { %222 = vsyncpa [#allocation8], 1 }
  0x6a   :  { %223 = vsyncpa [#allocation6], 1 }
  0x6b   :  { %224 = vsyncpa [#allocation11], 1 }

</bundles_post_ra>
